<compile_context>
chip_gen: v6e
topology: v6e:2x2x1
jax: 0.10.0
libtpu: 0.0.40
codegen_flags: <defaults>
</compile_context>

<pallas_src>
import jax
import jax.numpy as jnp
from jax.experimental import pallas as pl
from jax.experimental.pallas import tpu as pltpu

_LANES = 1024                  # lane-dense last dim (multiple of 128 -> unmasked vst)
_TARGET_TILE_BYTES = 4 << 20   # ~4 MiB tile; 2 bufs x (in+out) ~= 16 MiB VMEM
_MIN_KERNEL_BYTES = 1 << 20    # below this, dispatch overhead dominates -> bypass
_VMEM_LIMIT_BYTES = 32 << 20   # safe on v5e (128 MiB), v6e (128 MiB), v7x (64 MiB)


def _copy_kernel(x_ref, o_ref):
    # Pure pass-through: load full tile, store it unchanged.
    o_ref[...] = x_ref[...]


def _tile_rows_for(rows: int, itemsize: int) -> int:
    """Byte-based tile sizing so bf16/int8 get the same VMEM footprint as f32."""
    t = max(8, (_TARGET_TILE_BYTES // (_LANES * itemsize)) // 8 * 8)
    # Ensure >= 2 grid steps when possible so v7x's 2 TensorCores both drive HBM.
    if rows >= 16:
        t = min(t, max(8, (rows // 2) // 8 * 8))
    if rows <= t:
        return rows  # full-extent block: always a legal BlockSpec
    return t


@jax.jit
def _identity_2d(x2d: jax.Array) -> jax.Array:
    """Tiled, pipelined identity copy of a lane-dense (rows, _LANES) slab."""
    rows, lanes = x2d.shape
    tile_rows = _tile_rows_for(rows, x2d.dtype.itemsize)
    grid = (pl.cdiv(rows, tile_rows),)

    return pl.pallas_call(
        _copy_kernel,
        out_shape=jax.ShapeDtypeStruct((rows, lanes), x2d.dtype),
        grid=grid,
        in_specs=[pl.BlockSpec((tile_rows, lanes), lambda i: (i, 0))],
        out_specs=pl.BlockSpec((tile_rows, lanes), lambda i: (i, 0)),
        compiler_params=pltpu.CompilerParams(
            dimension_semantics=("parallel",),
            vmem_limit_bytes=_VMEM_LIMIT_BYTES,
        ),
        cost_estimate=pl.CostEstimate(
            flops=0,
            transcendentals=0,
            bytes_accessed=2 * x2d.size * x2d.dtype.itemsize,
        ),
    )(x2d)


def print_forward(x: jax.Array, *, force_kernel: bool = False) -> jax.Array:
    """Equivalent of Print.forward: print the shape, return x unchanged.

    Fastest correct implementation is `return x`; the Pallas copy is taken
    only for large, lane-dense tensors (or when forced for testing), with no
    pad/slice copies around it.
    """
    # Host-side print of the (static) shape — matches torch's print of static
    # shape metadata.  NOTE: under an outer jax.jit this fires at trace time
    # only; use jax.debug.print if per-execution printing is required.
    print(tuple(x.shape))

    total = int(x.size)
    nbytes = total * x.dtype.itemsize
    lane_dense = total > 0 and total % _LANES == 0

    take_kernel = lane_dense and (force_kernel or nbytes >= _MIN_KERNEL_BYTES)
    if not take_kernel:
        # Identity hot path: zero HBM traffic, zero launch overhead.
        return x

    rows = total // _LANES
    # Collapsing to (rows, _LANES) is a free row-major reshape (no copy, since
    # total is a multiple of _LANES).
    out2d = _identity_2d(x.reshape(rows, _LANES))
    return out2d.reshape(x.shape)


if __name__ == "__main__":
    key = jax.random.PRNGKey(0)
    k1, k2 = jax.random.split(key)

    # Small NCHW input, as Print would see inside a conv-style pipeline.
    x = jax.random.normal(k1, (2, 4, 16, 16), dtype=jnp.float32)

    # 1) Default path: small input -> bypass (pure identity).
    y = jax.block_until_ready(print_forward(x))
    assert y.shape == x.shape and y.dtype == x.dtype
    assert bool(jnp.all(y == x))

    # 2) Force the Pallas copy path once on the same small input
    #    (2048 elems -> (2, 1024) full-extent block, single grid step).
    y_k = jax.block_until_ready(print_forward(x, force_kernel=True))
    assert y_k.shape == x.shape and y_k.dtype == x.dtype
    assert bool(jnp.all(y_k == x))

    # 3) A medium input that naturally takes the tiled kernel path
    #    (4 MiB -> rows=1024, tile_rows=512, grid=(2,)).
    x_big = jax.random.normal(k2, (2, 8, 256, 256), dtype=jnp.float32)
    y_big = jax.block_until_ready(print_forward(x_big))
    assert y_big.shape == x_big.shape and y_big.dtype == x_big.dtype
    assert bool(jnp.all(y_big == x_big))

    print("KERNEL_OK")
</pallas_src>

<mosaic_0001>
module attributes {stable_mosaic.version = 11 : i64} {
  func.func @_copy_kernel(%arg0: i32, %arg1: memref<2x1024xf32, #tpu.memory_space<vmem>>, %arg2: memref<2x1024xf32, #tpu.memory_space<vmem>>) attributes {dimension_semantics = [#tpu.dimension_semantics<parallel>], iteration_bounds = array<i64: 1>, scalar_prefetch = 0 : i64, scratch_operands = 0 : i64, tpu.core_type = #tpu.core_type<tc>, window_params = [{transform_indices = @transform_0, window_bounds = array<i64: 2, 1024>}, {transform_indices = @transform_1, window_bounds = array<i64: 2, 1024>}]} {
    %c0 = arith.constant 0 : index
    %c0_0 = arith.constant 0 : index
    %0 = vector.load %arg1[%c0, %c0_0] : memref<2x1024xf32, #tpu.memory_space<vmem>>, vector<2x1024xf32>
    %c0_1 = arith.constant 0 : index
    %c0_2 = arith.constant 0 : index
    %1 = vector.load %arg2[%c0_1, %c0_2] : memref<2x1024xf32, #tpu.memory_space<vmem>>, vector<2x1024xf32>
    tpu.vector_store %arg2[%c0_1, %c0_2], %0 {strides = array<i32>} : memref<2x1024xf32, #tpu.memory_space<vmem>>, vector<2x1024xf32>,
    return
  }
  func.func @transform_0(%arg0: i32) -> (i32, i32) {
    %c0_i32 = arith.constant 0 : i32
    %c0_i32_0 = arith.constant 0 : i32
    return %arg0, %c0_i32 : i32, i32
  }
  func.func @transform_1(%arg0: i32) -> (i32, i32) {
    %c0_i32 = arith.constant 0 : i32
    %c0_i32_0 = arith.constant 0 : i32
    return %arg0, %c0_i32 : i32, i32
  }
}

</mosaic_0001>

<bundles_post_ra>
// kernel: _identity_2d.1
= control target key start
LH: loop header
LB: loop body
LE: loop exit
PB: predicated region body
PF: predicated region fallthrough
CT: control target
= control target key end

     0   :  { %6 = vsyncpa [#allocation3], 0  ;;  %s104_s0 = inlined_call_operand.hbm [shape: f32[2,1024], index: 0, kind: input, shape index: {}]   ;;  %s105_s1 = inlined_call_operand.hbm [shape: f32[2,1024], index: 1, kind: output, shape index: {}]  }
   0x1   :  { %7 = vsyncpa [#allocation4], 0  ;;  %s86_s6 = smov [#allocation2]  }
   0x2   :  { %s14_s7 = sshll.u32 %s86_s6, 4  ;;  %s15_s7 = int_to_ptr.vmem [resolvable:$true] %s14_s7 }
   0x3   :  { %s50_s8 = scalar_lea.vmem %s15_s7, 256  ;;  %p55_p1 = scmp.lt.s32.totalorder %s15_s7, %s15_s7 }
   0x4   :  { %p51_p0 = scmp.ne.s32.totalorder %s15_s7, %s50_s8  ;;  %p56_p2 = scmp.lt.s32.totalorder %s50_s8, %s50_s8 }
   0x6   :  { %p57_p3 = por %p56_p2, %p55_p1 }
   0x8   :  { %p58_p4 = pnand %p57_p3, %p51_p0 }
   0xa   :  { %61 = shalt.err (!%p58_p4)
}
   0xb   :  { %17 = dma.hbm_to_vmem [thread:$0]  %s104_s0, 256, %s15_s7, [#allocation3]  }
   0xc   :  { %82 = dma.done.wait [#allocation3], 256  }
   0xd   :  { %83 = vsyncadd [#allocation3], 4294967040  ;;  %s87_s11 = smov [#allocation5]   ;;  %v21_v0 = vld [vmem:[#allocation2] sm:$0xff]  ;;  %v22_v1 = vld [vmem:[#allocation2 + $0x8] sm:$0xff] }
   0xe   :  { %s31_s12 = sshll.u32 %s87_s11, 4  ;;  %23 = vst [vmem:[#allocation5] sm:$0xff] %v21_v0  ;;  %24 = vst [vmem:[#allocation5 + $0x8] sm:$0xff] %v22_v1  ;;  %s32_s12 = int_to_ptr.vmem [resolvable:$true] %s31_s12 }
   0xf   :  { %s62_s13 = scalar_lea.vmem %s32_s12, 256  ;;  %p67_p6 = scmp.lt.s32.totalorder %s32_s12, %s32_s12 }
  0x10   :  { %p63_p5 = scmp.ne.s32.totalorder %s32_s12, %s62_s13  ;;  %p68_p7 = scmp.lt.s32.totalorder %s62_s13, %s62_s13 }
  0x12   :  { %p69_p8 = por %p68_p7, %p67_p6 }
  0x14   :  { %p70_p9 = pnand %p69_p8, %p63_p5 }
  0x16   :  { %73 = shalt.err (!%p70_p9)
}
  0x17   :  { %34 = dma.vmem_to_hbm [thread:$0]  %s32_s12, 256, %s105_s1, [#allocation4]  }
  0x18   :  { %84 = dma.done.wait [#allocation4], 256  }
  0x19   :  { %85 = vsyncadd [#allocation4], 4294967040 }
  0x1a   :  { %38 = vsyncpa [#allocation3], 1 }
  0x1b   :  { %39 = vsyncpa [#allocation4], 1 }

</bundles_post_ra>
